<compile_context>
chip_gen: v7x
topology: tpu7x:2x2x1
jax: 0.10.0
libtpu: 0.0.40
codegen_flags: <defaults>
</compile_context>

<pallas_src>
import jax
import jax.numpy as jnp
from jax.experimental import pallas as pl
from jax.experimental.pallas import tpu as pltpu

_LANE = 128


def _round_up(n, m):
    return ((n + m - 1) // m) * m


def _vmem_budget_bytes():
    """Per-generation VMEM budget with headroom (v7x: ~48 MiB, v5e/v6e: ~96 MiB)."""
    try:
        phys = int(pltpu.get_tpu_info().vmem_capacity_bytes)
    except Exception:
        phys = 64 * 1024 * 1024  # conservative (v7x per-TC) fallback
    return max((phys * 3) // 4, 32 * 1024 * 1024)


def _gating_kernel(x_ref, wt_ref, b_ref, o_ref):
    # Hot path: cast x tile to the weight dtype in VMEM (bf16 by default),
    # MXU matmul with f32 accumulation, f32 bias add, store in output dtype.
    x = x_ref[...].astype(wt_ref.dtype)
    acc = jnp.dot(x, wt_ref[...], preferred_element_type=jnp.float32)
    o_ref[...] = (acc + b_ref[...].astype(jnp.float32)).astype(o_ref.dtype)


def prepare_gating_params(weight, bias, operand_dtype=jnp.bfloat16):
    """One-time parameter prep (do this at init, not per forward).

    weight: [E, D] (PyTorch nn.Linear layout), bias: [E]
    Returns lane-padded, pre-transposed params:
      wt_pad [D, E_pad] in `operand_dtype` (bf16 default -> halves weight traffic
      and avoids the f32 MXU multi-pass; f32 accumulation is kept in-kernel),
      b_pad  [1, E_pad] in f32.
    """
    E, D = weight.shape
    E_pad = _round_up(max(E, 1), _LANE)
    wt_pad = jnp.zeros((D, E_pad), operand_dtype).at[:, :E].set(
        weight.T.astype(operand_dtype))
    b_pad = jnp.zeros((1, E_pad), jnp.float32).at[:, :E].set(
        bias.astype(jnp.float32))
    return wt_pad, b_pad


def gating_forward(x, wt_pad, b_pad, num_experts, *, tb_cap=None):
    """x: [B, D] -> logits [B, num_experts] (same dtype as x)."""
    B, D = x.shape
    D2, E_pad = wt_pad.shape
    assert D == D2, f"feature dim mismatch: {D} vs {D2}"

    x_item = jnp.dtype(x.dtype).itemsize
    wt_item = jnp.dtype(wt_pad.dtype).itemsize
    out_item = x_item  # output dtype == x dtype

    vmem_budget = _vmem_budget_bytes()

    # --- batch tile selection ------------------------------------------------
    if tb_cap is None:
        # Target ~4 MiB of streamed x per tile (per-step overhead ~0.35 us),
        # clamped to [256, 2048] rows.
        tb_cap = (4 << 20) // max(D * x_item, 1)
        tb_cap = max(256, min(2048, _round_up(max(tb_cap, 8), 8)))

    n_tiles = pl.cdiv(B, tb_cap)
    # v7x megacore: give each of the 2 TensorCores >= 4 pipelined tiles once the
    # batch is large enough that every tile still keeps >= 256 rows.
    if n_tiles < 8 and B >= 8 * 256:
        n_tiles = 8

    TB = _round_up(pl.cdiv(B, n_tiles), 8)
    if TB >= B:
        TB = B  # single tile; block dim == full array dim is always legal

    def _tile_bytes(tb):
        return (2 * tb * D * x_item            # double-buffered x tiles
                + D * E_pad * wt_item          # resident pre-transposed weight
                + E_pad * 4                    # resident bias (f32)
                + 2 * tb * E_pad * out_item)   # double-buffered output tiles

    # Shrink TB if the double-buffered working set would blow the VMEM budget.
    # TODO(synk): for very large D (>~16K), add a K grid axis ("arbitrary") with a
    # VMEM f32 accumulator instead of shrinking TB below the pipeline sweet spot.
    while TB > 8 and _tile_bytes(TB) > vmem_budget:
        TB = max(8, _round_up(TB // 2, 8))

    grid = (pl.cdiv(B, TB),)
    vmem_limit = int(min(max(2 * _tile_bytes(TB), 32 << 20), vmem_budget))

    out_pad = pl.pallas_call(
        _gating_kernel,
        out_shape=jax.ShapeDtypeStruct((B, E_pad), x.dtype),
        grid_spec=pl.GridSpec(
            grid=grid,
            in_specs=[
                pl.BlockSpec((TB, D), lambda i: (i, 0)),      # streamed x tiles
                pl.BlockSpec((D, E_pad), lambda i: (0, 0)),   # resident weight
                pl.BlockSpec((1, E_pad), lambda i: (0, 0)),   # resident bias
            ],
            out_specs=pl.BlockSpec((TB, E_pad), lambda i: (i, 0)),
        ),
        compiler_params=pltpu.CompilerParams(
            dimension_semantics=("parallel",),   # shard batch tiles across TCs
            vmem_limit_bytes=vmem_limit,
        ),
    )(x, wt_pad, b_pad)

    # Column slice back to num_experts; fuses into the consumer under jit.
    return out_pad[:, :num_experts]


if __name__ == "__main__":
    # Small shapes consistent with the module: batch=8, input_dim=32, num_experts=8.
    B, D, E = 8, 32, 8
    key = jax.random.PRNGKey(0)
    kx, kw, kb, kx2, kx3 = jax.random.split(key, 5)

    # Deterministic parameter init mimicking nn.Linear: U(-1/sqrt(D), 1/sqrt(D)).
    bound = 1.0 / (D ** 0.5)
    weight = jax.random.uniform(kw, (E, D), jnp.float32, -bound, bound)
    bias = jax.random.uniform(kb, (E,), jnp.float32, -bound, bound)
    x = jax.random.normal(kx, (B, D), jnp.float32)
    ref = x @ weight.T + bias

    # Default bf16-operand path (f32 accumulation kept in-kernel).
    wt_bf16, b_f32 = prepare_gating_params(weight, bias)
    out = jax.block_until_ready(gating_forward(x, wt_bf16, b_f32, E))
    assert out.shape == (B, E)
    assert jnp.allclose(out, ref, atol=5e-2, rtol=5e-2)

    # Exact f32 path with tight tolerance.
    wt_f32, _ = prepare_gating_params(weight, bias, operand_dtype=jnp.float32)
    out_f32 = jax.block_until_ready(gating_forward(x, wt_f32, b_f32, E))
    assert jnp.allclose(out_f32, ref, atol=1e-5, rtol=1e-5)

    # Ragged batch: multiple pipelined tiles + a clamped partial final block
    # (no jnp.pad of x anywhere). tb_cap lowered only to force >1 grid step here.
    B2 = 200
    x2 = jax.random.normal(kx2, (B2, D), jnp.float32)
    out2 = jax.block_until_ready(gating_forward(x2, wt_f32, b_f32, E, tb_cap=64))
    ref2 = x2 @ weight.T + bias
    assert out2.shape == (B2, E)
    assert jnp.allclose(out2, ref2, atol=1e-5, rtol=1e-5)

    # Tiny batch (< 8 rows): single block whose dims equal the full array dims.
    B3 = 3
    x3 = jax.random.normal(kx3, (B3, D), jnp.float32)
    out3 = jax.block_until_ready(gating_forward(x3, wt_f32, b_f32, E))
    ref3 = x3 @ weight.T + bias
    assert out3.shape == (B3, E)
    assert jnp.allclose(out3, ref3, atol=1e-5, rtol=1e-5)

    print("KERNEL_OK")
</pallas_src>

<mosaic_0001>
module attributes {stable_mosaic.version = 11 : i64} {
  func.func @_gating_kernel(%arg0: i32, %arg1: memref<8x32xf32, #tpu.memory_space<vmem>>, %arg2: memref<32x128xbf16, #tpu.memory_space<vmem>>, %arg3: memref<1x128xf32, #tpu.memory_space<vmem>>, %arg4: memref<8x128xf32, #tpu.memory_space<vmem>>) attributes {dimension_semantics = [#tpu.dimension_semantics<parallel>], iteration_bounds = array<i64: 1>, scalar_prefetch = 0 : i64, scratch_operands = 0 : i64, tpu.core_type = #tpu.core_type<tc>, window_params = [{transform_indices = @transform_0, window_bounds = array<i64: 8, 32>}, {pipeline_mode = #tpu.pipeline_mode<synchronous>, transform_indices = @transform_1, window_bounds = array<i64: 32, 128>}, {pipeline_mode = #tpu.pipeline_mode<synchronous>, transform_indices = @transform_2, window_bounds = array<i64: 1, 128>}, {transform_indices = @transform_3, window_bounds = array<i64: 8, 128>}]} {
    %c0 = arith.constant 0 : index
    %c0_0 = arith.constant 0 : index
    %0 = vector.load %arg1[%c0, %c0_0] : memref<8x32xf32, #tpu.memory_space<vmem>>, vector<8x32xf32>
    %1 = arith.truncf %0 : vector<8x32xf32> to vector<8x32xbf16>
    %c0_1 = arith.constant 0 : index
    %c0_2 = arith.constant 0 : index
    %2 = vector.load %arg2[%c0_1, %c0_2] : memref<32x128xbf16, #tpu.memory_space<vmem>>, vector<32x128xbf16>
    %cst = arith.constant dense<0.000000e+00> : vector<8x128xf32>
    %3 = tpu.matmul %1, %2, %cst {dimension_numbers = #tpu.dot_dimension_numbers<[1], [0], [0], [1], [0, 0, 1, 1], [], []>} : vector<8x32xbf16>, vector<32x128xbf16>, vector<8x128xf32> -> vector<8x128xf32>
    %c0_3 = arith.constant 0 : index
    %c0_4 = arith.constant 0 : index
    %4 = vector.load %arg3[%c0_3, %c0_4] : memref<1x128xf32, #tpu.memory_space<vmem>>, vector<1x128xf32>
    %5 = vector.broadcast %4 : vector<1x128xf32> to vector<8x128xf32>
    %6 = arith.addf %3, %5 : vector<8x128xf32>
    %c0_5 = arith.constant 0 : index
    %c0_6 = arith.constant 0 : index
    %7 = vector.load %arg4[%c0_5, %c0_6] : memref<8x128xf32, #tpu.memory_space<vmem>>, vector<8x128xf32>
    tpu.vector_store %arg4[%c0_5, %c0_6], %6 {strides = array<i32>} : memref<8x128xf32, #tpu.memory_space<vmem>>, vector<8x128xf32>,
    return
  }
  func.func @transform_0(%arg0: i32) -> (i32, i32) {
    %c0_i32 = arith.constant 0 : i32
    %c0_i32_0 = arith.constant 0 : i32
    return %arg0, %c0_i32 : i32, i32
  }
  func.func @transform_1(%arg0: i32) -> (i32, i32) {
    %c0_i32 = arith.constant 0 : i32
    %c0_i32_0 = arith.constant 0 : i32
    %c0_i32_1 = arith.constant 0 : i32
    return %c0_i32, %c0_i32_0 : i32, i32
  }
  func.func @transform_2(%arg0: i32) -> (i32, i32) {
    %c0_i32 = arith.constant 0 : i32
    %c0_i32_0 = arith.constant 0 : i32
    %c0_i32_1 = arith.constant 0 : i32
    return %c0_i32, %c0_i32_0 : i32, i32
  }
  func.func @transform_3(%arg0: i32) -> (i32, i32) {
    %c0_i32 = arith.constant 0 : i32
    %c0_i32_0 = arith.constant 0 : i32
    return %arg0, %c0_i32 : i32, i32
  }
}

</mosaic_0001>

<bundles_post_ra>
// kernel: tpu_custom_call.1
= control target key start
LH: loop header
LB: loop body
LE: loop exit
PB: predicated region body
PF: predicated region fallthrough
CT: control target
= control target key end

     0   :  { %8 = vsyncpa [#allocation3], 0  ;;  %s297_s0 = inlined_call_operand.hbm [shape: f32[8,32], index: 0, kind: input, shape index: {}]   ;;  %s298_s1 = inlined_call_operand.hbm [shape: bf16[32,128], index: 1, kind: input, shape index: {}]   ;;  %s299_s2 = inlined_call_operand.vmem [shape: f32[1,128], index: 2, kind: input, shape index: {}]   ;;  %s300_s3 = inlined_call_operand.hbm [shape: f32[8,128], index: 3, kind: output, shape index: {}]  }
   0x1   :  { %9 = vsyncpa [#allocation6], 0 }
   0x2   :  { %10 = vsyncpa [#allocation4], 0  ;;  %s224_s12 = smov [#allocation2]   ;;  %s225_s14 = smov [#allocation5]  }
   0x3   :  { %s17_s13 = sshll.u32 %s224_s12, 4  ;;  %s26_s15 = sshll.u32 %s225_s14, 4  ;;  %s18_s13 = int_to_ptr.vmem [resolvable:$true] %s17_s13  ;;  %s251_s15 = int_to_ptr.vmem [resolvable:$true] %s26_s15 }
   0x4   :  { %s152_s18 = scalar_lea.hbm %s297_s0, 128 }
   0x5   :  { %p153_p0 = scmp.ne.s32.totalorder %s297_s0, %s152_s18  ;;  %p156_p1 = scmp.lt.u32.totalorder %s152_s18, %s297_s0 }
   0x7   :  { %p158_p2 = pnand %p156_p1, %p153_p0 }
   0x9   :  { %161 = shalt.err (!%p158_p2)
}
   0xa   :  { %s162_s23 = scalar_lea.vmem %s18_s13, 128  ;;  %p167_p4 = scmp.lt.s32.totalorder %s18_s13, %s18_s13 }
   0xb   :  { %p163_p3 = scmp.ne.s32.totalorder %s18_s13, %s162_s23  ;;  %p168_p5 = scmp.lt.s32.totalorder %s162_s23, %s162_s23 }
   0xd   :  { %p169_p6 = por %p168_p5, %p167_p4 }
   0xf   :  { %p170_p7 = pnand %p169_p6, %p163_p3 }
  0x11   :  { %173 = shalt.err (!%p170_p7)
}
  0x12   :  { %20 = dma.hbm_to_vmem [thread:$0]  %s297_s0, 128, %s18_s13, [#allocation3]  }
  0x13   :  { %s174_s28 = scalar_lea.hbm %s298_s1, 256 }
  0x14   :  { %p175_p8 = scmp.ne.s32.totalorder %s298_s1, %s174_s28  ;;  %p178_p9 = scmp.lt.u32.totalorder %s174_s28, %s298_s1 }
  0x16   :  { %p180_p10 = pnand %p178_p9, %p175_p8 }
  0x18   :  { %183 = shalt.err (!%p180_p10)
}
  0x19   :  { %s184_s6 = scalar_lea.vmem %s251_s15, 256  ;;  %p189_p12 = scmp.lt.s32.totalorder %s251_s15, %s251_s15 }
  0x1a   :  { %p185_p11 = scmp.ne.s32.totalorder %s251_s15, %s184_s6  ;;  %p190_p13 = scmp.lt.s32.totalorder %s184_s6, %s184_s6 }
  0x1c   :  { %p191_p0 = por %p190_p13, %p189_p12 }
  0x1e   :  { %p192_p1 = pnand %p191_p0, %p185_p11 }
  0x20   :  { %195 = shalt.err (!%p192_p1)
}
  0x21   :  { %s226_s0 = smov 64   ;;  %s227_s7 = smov 4  }
  0x22   :  { %32 = dma.hbm_to_vmem [thread:$0]  %s298_s1, 256, %s251_s15, [#allocation6], %s226_s0, %s226_s0, %s227_s7  }
  0x23   :  { %218 = dma.done.wait [#allocation3], 128  }
  0x24   :  { %219 = vsyncadd [#allocation3], 4294967168 }
  0x25   :  { %220 = dma.done.wait [#allocation6], 256  }
  0x26   :  { %221 = vsyncadd [#allocation6], 4294967040  ;;  %v228_v0 = vmov 0.0   ;;  %vm229_vm0 = vmmov 0   ;;  %v150_v1 = vld [vmem:[#allocation5] sm:$0xff]   ;;  %v151_v2 = vld [vmem:[#allocation5 + $0x8] sm:$0xff]  }
  0x27   :  { %135 = vmatprep.subr.bf16.mxu0 %v228_v0  ;;  %139 = vmatprep.mubr.msk.bf16.mxu0 %vm229_vm0, %v228_v0  ;;  %v42_v3 = vld [vmem:[#allocation2] sm:$0xff]  ;;  %vm67_vm1 = vcmask 261120   ;;  %s230_s1 = smov [#allocation7]  }
  0x28   :  { %136 = vmatpush3.bf16.msra.mxu0 %v150_v1  ;;  %v43_v4 = vpack.c.bf16 %v42_v3, %v42_v3  ;;  %v128_v5 = vld [vmem:[%s299_s2] ss:$0 sm:$0xff]  ;;  %s118_s12 = sshll.u32 %s230_s1, 4  ;;  %s119_s12 = int_to_ptr.vmem [resolvable:$true] %s118_s12 }
  0x29   :  { %137 = vmatprep.subr.bf16.mxu0 %v228_v0  ;;  %s196_s13 = scalar_lea.vmem %s119_s12, 128  ;;  %p201_p3 = scmp.lt.s32.totalorder %s119_s12, %s119_s12 }
  0x2a   :  { %p197_p2 = scmp.ne.s32.totalorder %s119_s12, %s196_s13  ;;  %p202_p4 = scmp.lt.s32.totalorder %s196_s13, %s196_s13 }
  0x2c   :  { %138 = vmatpush3.bf16.msra.mxu0 %v151_v2  ;;  %p203_p5 = por %p202_p4, %p201_p3 }
  0x2e   :  { %p204_p6 = pnand %p203_p5, %p197_p2 }
  0x2f   :  { %140 = vmatmul.mubr.msk.bf16.vlgmr.msra.gmra.mrb[0].mxu0 %vm67_vm1, %v43_v4 }
 0x102   :  { %v105_v6 = vpop.f32.mrb[0].mxu0 }
 0x103   :  { %v106_v7 = vadd.f32 %v128_v5, %v105_v6  ;;  %v141_v8 = vpop.f32.mrb[1].mxu0 }
 0x104   :  { %v108_v9 = vpop.f32.mrb[2].mxu0 }
 0x105   :  { %111 = vst [vmem:[#allocation7] sm:$0xff] %v106_v7  ;;  %v142_v10 = vpop.f32.mrb[3].mxu0 }
 0x106   :  { %207 = shalt.err (!%p204_p6)
}
 0x107   :  { %s208_s2 = scalar_lea.hbm %s300_s3, 128 }
 0x108   :  { %p209_p7 = scmp.ne.s32.totalorder %s300_s3, %s208_s2  ;;  %p212_p8 = scmp.lt.u32.totalorder %s208_s2, %s300_s3 }
 0x10a   :  { %p214_p9 = pnand %p212_p8, %p209_p7 }
 0x10c   :  { %217 = shalt.err (!%p214_p9)
}
 0x10d   :  { %121 = dma.vmem_to_hbm [thread:$0]  %s119_s12, 128, %s300_s3, [#allocation4]  }
 0x10e   :  { %222 = dma.done.wait [#allocation4], 128  }
 0x10f   :  { %223 = vsyncadd [#allocation4], 4294967168 }
 0x110   :  { %125 = vsyncpa [#allocation3], 1 }
 0x111   :  { %126 = vsyncpa [#allocation6], 1 }
 0x112   :  { %127 = vsyncpa [#allocation4], 1 }

</bundles_post_ra>
